<compile_context>
chip_gen: v7x
topology: tpu7x:2x2x1
jax: 0.10.0
libtpu: 0.0.40
codegen_flags: <defaults>
</compile_context>

<pallas_src>
import jax
import jax.numpy as jnp
from jax.experimental import pallas as pl
from jax.experimental.pallas import tpu as pltpu


# ----------------------------------------------------------------------------
# Plain-JAX glue: fold eval-mode BatchNorm1d into the preceding Linear (exact)
# ----------------------------------------------------------------------------
def _fold_bn_into_linear(w, b, gamma, beta, mean, var, eps=1e-5):
    """y = BN(x @ w + b) == x @ (w*s) + ((b - mean)*s + beta),  s = gamma/sqrt(var+eps)."""
    s = gamma / jnp.sqrt(var + eps)                     # [out]
    return w * s[None, :], (b - mean) * s + beta        # w: [in, out], bias: [out]


# ----------------------------------------------------------------------------
# Fused MLP kernel: relu((relu(x @ W1' + c1) @ W2' + c2))
# ----------------------------------------------------------------------------
def _mlp_kernel(x_ref, w1_ref, c1_ref, w2_ref, c2_ref, o_ref):
    # x_ref: (TB, IN) bf16   w1_ref: (IN, HID) bf16   c1_ref: (1, HID) f32
    # w2_ref: (HID, OUT) bf16   c2_ref: (1, OUT) f32   o_ref: (TB, OUT) f32
    h = jnp.dot(x_ref[...], w1_ref[...], preferred_element_type=jnp.float32)
    h = jnp.maximum(h + c1_ref[...], 0.0)
    # TODO(synk): Dropout(0.2) is identity in eval mode; training-mode Bernoulli
    # mask and batch-statistics BatchNorm are intentionally omitted.
    y = jnp.dot(h.astype(w2_ref.dtype), w2_ref[...],
                preferred_element_type=jnp.float32)
    o_ref[...] = jnp.maximum(y + c2_ref[...], 0.0).astype(o_ref.dtype)


# ----------------------------------------------------------------------------
# Tiling policy
# ----------------------------------------------------------------------------
def _device_caps():
    """(batch-tile cap, has 2 TensorCores per chip)."""
    try:
        kind = jax.devices()[0].device_kind.lower()
    except Exception:  # pragma: no cover - e.g. AOT / unknown backend
        kind = ""
    cap = 512 if "v5" in kind else 1024     # v5e: 16 MiB scoped VMEM default
    two_tc = "v7" in kind                   # v7x: 2 TCs share "parallel" grid axes
    return cap, two_tc


def _pick_batch_tile(batch, cap, two_tc):
    """Batch tile: multiple of 8; single grid step on 1-TC chips when it fits."""
    b8 = ((batch + 7) // 8) * 8
    if b8 <= cap:
        if two_tc and b8 >= 16:
            return ((b8 // 2) + 7) // 8 * 8   # >=2 tiles so both v7x cores get work
        return b8                              # 1 step: no per-step overhead on 1-TC chips
    return cap


# ----------------------------------------------------------------------------
# Wrapper
# ----------------------------------------------------------------------------
@jax.jit
def drug_embedding_forward(x, w1, b1, g1, be1, m1, v1, w2, b2, g2, be2, m2, v2):
    """x: [B, 768] float32 -> [B, 256] float32 (eval-mode forward)."""
    batch, in_dim = x.shape
    hid = w1.shape[1]
    out_dim = w2.shape[1]

    # Fold the two eval-mode BatchNorms into the two Linears (exact, once per call).
    w1f, c1 = _fold_bn_into_linear(w1, b1, g1, be1, m1, v1)
    w2f, c2 = _fold_bn_into_linear(w2, b2, g2, be2, m2, v2)

    # bf16 MXU inputs (single-pass), f32 accumulation and f32 bias/output.
    x_bf = x.astype(jnp.bfloat16)
    w1f = w1f.astype(jnp.bfloat16)
    w2f = w2f.astype(jnp.bfloat16)
    c1 = c1.reshape(1, hid).astype(jnp.float32)
    c2 = c2.reshape(1, out_dim).astype(jnp.float32)

    cap, two_tc = _device_caps()
    tb = _pick_batch_tile(batch, cap, two_tc)
    grid = (pl.cdiv(batch, tb),)   # ragged last block: masked read / dropped OOB write

    flops = 2 * batch * (in_dim * hid + hid * out_dim)
    bytes_accessed = (batch * (in_dim * 2 + out_dim * 4)               # x (bf16) + out (f32)
                      + (in_dim * hid + hid * out_dim) * 2             # bf16 weights
                      + (hid + out_dim) * 4)                           # fused biases

    return pl.pallas_call(
        _mlp_kernel,
        out_shape=jax.ShapeDtypeStruct((batch, out_dim), x.dtype),
        grid=grid,
        in_specs=[
            pl.BlockSpec((tb, in_dim), lambda i: (i, 0)),       # x tile (streams)
            pl.BlockSpec((in_dim, hid), lambda i: (0, 0)),      # W1' resident in VMEM
            pl.BlockSpec((1, hid), lambda i: (0, 0)),           # fused bias/BN shift 1
            pl.BlockSpec((hid, out_dim), lambda i: (0, 0)),     # W2' resident in VMEM
            pl.BlockSpec((1, out_dim), lambda i: (0, 0)),       # fused bias/BN shift 2
        ],
        out_specs=pl.BlockSpec((tb, out_dim), lambda i: (i, 0)),
        compiler_params=pltpu.CompilerParams(
            dimension_semantics=("parallel",),                  # batch tiles independent
        ),
        cost_estimate=pl.CostEstimate(flops=flops, transcendentals=0,
                                      bytes_accessed=bytes_accessed),
    )(x_bf, w1f, c1, w2f, c2)


# ----------------------------------------------------------------------------
# Pure-JAX reference (literal translation of the PyTorch module, eval mode)
# ----------------------------------------------------------------------------
def reference_forward(x, w1, b1, g1, be1, m1, v1, w2, b2, g2, be2, m2, v2, eps=1e-5):
    h = x @ w1 + b1
    h = (h - m1) / jnp.sqrt(v1 + eps) * g1 + be1
    h = jnp.maximum(h, 0.0)
    # Dropout(0.2) in eval mode is identity.
    y = h @ w2 + b2
    y = (y - m2) / jnp.sqrt(v2 + eps) * g2 + be2
    return jnp.maximum(y, 0.0)


if __name__ == "__main__":
    input_dim, hidden_dim, output_dim = 768, 512, 256   # module defaults
    batch = 16                                          # small test batch

    key = jax.random.PRNGKey(0)
    ks = jax.random.split(key, 13)

    def uni(k, shape, bound):
        return jax.random.uniform(k, shape, jnp.float32, -bound, bound)

    # Linear 1 (stored as [in, out]) + BatchNorm1d(512) params / running stats
    w1 = uni(ks[0], (input_dim, hidden_dim), 1.0 / input_dim ** 0.5)
    b1 = uni(ks[1], (hidden_dim,), 1.0 / input_dim ** 0.5)
    g1 = 1.0 + 0.1 * jax.random.normal(ks[2], (hidden_dim,), jnp.float32)
    be1 = 0.1 * jax.random.normal(ks[3], (hidden_dim,), jnp.float32)
    m1 = 0.1 * jax.random.normal(ks[4], (hidden_dim,), jnp.float32)
    v1 = jnp.abs(jax.random.normal(ks[5], (hidden_dim,), jnp.float32)) + 0.5

    # Linear 2 + BatchNorm1d(256)
    w2 = uni(ks[6], (hidden_dim, output_dim), 1.0 / hidden_dim ** 0.5)
    b2 = uni(ks[7], (output_dim,), 1.0 / hidden_dim ** 0.5)
    g2 = 1.0 + 0.1 * jax.random.normal(ks[8], (output_dim,), jnp.float32)
    be2 = 0.1 * jax.random.normal(ks[9], (output_dim,), jnp.float32)
    m2 = 0.1 * jax.random.normal(ks[10], (output_dim,), jnp.float32)
    v2 = jnp.abs(jax.random.normal(ks[11], (output_dim,), jnp.float32)) + 0.5

    params = (w1, b1, g1, be1, m1, v1, w2, b2, g2, be2, m2, v2)
    x = jax.random.normal(ks[12], (batch, input_dim), jnp.float32)

    # Case 1: batch divisible by 8 (clean tiling).
    out = jax.block_until_ready(drug_embedding_forward(x, *params))
    ref = reference_forward(x, *params)
    assert out.shape == (batch, output_dim) and out.dtype == x.dtype
    err = float(jnp.max(jnp.abs(out - ref)))
    # Tolerance accommodates bf16 MXU inputs (f32 accumulation) vs XLA default precision.
    assert err < 3e-2, err

    # Case 2: ragged batch (13 rows) -> exercises the no-pad/no-slice path with a
    # partial last block (masked read, OOB rows dropped on write).
    x_odd = x[:13]
    out_odd = jax.block_until_ready(drug_embedding_forward(x_odd, *params))
    ref_odd = reference_forward(x_odd, *params)
    assert out_odd.shape == (13, output_dim) and out_odd.dtype == x.dtype
    err_odd = float(jnp.max(jnp.abs(out_odd - ref_odd)))
    assert err_odd < 3e-2, err_odd

    print("KERNEL_OK")
</pallas_src>

<mosaic_0001>
module attributes {stable_mosaic.version = 11 : i64} {
  func.func @_mlp_kernel(%arg0: i32, %arg1: memref<16x768xbf16, #tpu.memory_space<vmem>>, %arg2: memref<768x512xbf16, #tpu.memory_space<vmem>>, %arg3: memref<1x512xf32, #tpu.memory_space<vmem>>, %arg4: memref<512x256xbf16, #tpu.memory_space<vmem>>, %arg5: memref<1x256xf32, #tpu.memory_space<vmem>>, %arg6: memref<16x256xf32, #tpu.memory_space<vmem>>) attributes {dimension_semantics = [#tpu.dimension_semantics<parallel>], iteration_bounds = array<i64: 1>, scalar_prefetch = 0 : i64, scratch_operands = 0 : i64, tpu.core_type = #tpu.core_type<tc>, window_params = [{transform_indices = @transform_0, window_bounds = array<i64: 16, 768>}, {pipeline_mode = #tpu.pipeline_mode<synchronous>, transform_indices = @transform_1, window_bounds = array<i64: 768, 512>}, {pipeline_mode = #tpu.pipeline_mode<synchronous>, transform_indices = @transform_2, window_bounds = array<i64: 1, 512>}, {pipeline_mode = #tpu.pipeline_mode<synchronous>, transform_indices = @transform_3, window_bounds = array<i64: 512, 256>}, {pipeline_mode = #tpu.pipeline_mode<synchronous>, transform_indices = @transform_4, window_bounds = array<i64: 1, 256>}, {transform_indices = @transform_5, window_bounds = array<i64: 16, 256>}]} {
    %c0 = arith.constant 0 : index
    %c0_0 = arith.constant 0 : index
    %0 = vector.load %arg1[%c0, %c0_0] : memref<16x768xbf16, #tpu.memory_space<vmem>>, vector<16x768xbf16>
    %c0_1 = arith.constant 0 : index
    %c0_2 = arith.constant 0 : index
    %1 = vector.load %arg2[%c0_1, %c0_2] : memref<768x512xbf16, #tpu.memory_space<vmem>>, vector<768x512xbf16>
    %cst = arith.constant dense<0.000000e+00> : vector<16x512xf32>
    %2 = tpu.matmul %0, %1, %cst {dimension_numbers = #tpu.dot_dimension_numbers<[1], [0], [0], [1], [0, 0, 1, 1], [], []>} : vector<16x768xbf16>, vector<768x512xbf16>, vector<16x512xf32> -> vector<16x512xf32>
    %c0_3 = arith.constant 0 : index
    %c0_4 = arith.constant 0 : index
    %3 = vector.load %arg3[%c0_3, %c0_4] : memref<1x512xf32, #tpu.memory_space<vmem>>, vector<1x512xf32>
    %4 = vector.broadcast %3 : vector<1x512xf32> to vector<16x512xf32>
    %5 = arith.addf %2, %4 : vector<16x512xf32>
    %cst_5 = arith.constant 0.000000e+00 : f32
    %6 = vector.broadcast %cst_5 : f32 to vector<16x512xf32>
    %7 = arith.maximumf %5, %6 : vector<16x512xf32>
    %8 = arith.truncf %7 : vector<16x512xf32> to vector<16x512xbf16>
    %c0_6 = arith.constant 0 : index
    %c0_7 = arith.constant 0 : index
    %9 = vector.load %arg4[%c0_6, %c0_7] : memref<512x256xbf16, #tpu.memory_space<vmem>>, vector<512x256xbf16>
    %cst_8 = arith.constant dense<0.000000e+00> : vector<16x256xf32>
    %10 = tpu.matmul %8, %9, %cst_8 {dimension_numbers = #tpu.dot_dimension_numbers<[1], [0], [0], [1], [0, 0, 1, 1], [], []>} : vector<16x512xbf16>, vector<512x256xbf16>, vector<16x256xf32> -> vector<16x256xf32>
    %c0_9 = arith.constant 0 : index
    %c0_10 = arith.constant 0 : index
    %11 = vector.load %arg5[%c0_9, %c0_10] : memref<1x256xf32, #tpu.memory_space<vmem>>, vector<1x256xf32>
    %12 = vector.broadcast %11 : vector<1x256xf32> to vector<16x256xf32>
    %13 = arith.addf %10, %12 : vector<16x256xf32>
    %cst_11 = arith.constant 0.000000e+00 : f32
    %14 = vector.broadcast %cst_11 : f32 to vector<16x256xf32>
    %15 = arith.maximumf %13, %14 : vector<16x256xf32>
    %c0_12 = arith.constant 0 : index
    %c0_13 = arith.constant 0 : index
    %16 = vector.load %arg6[%c0_12, %c0_13] : memref<16x256xf32, #tpu.memory_space<vmem>>, vector<16x256xf32>
    tpu.vector_store %arg6[%c0_12, %c0_13], %15 {strides = array<i32>} : memref<16x256xf32, #tpu.memory_space<vmem>>, vector<16x256xf32>,
    return
  }
  func.func @transform_0(%arg0: i32) -> (i32, i32) {
    %c0_i32 = arith.constant 0 : i32
    %c0_i32_0 = arith.constant 0 : i32
    return %arg0, %c0_i32 : i32, i32
  }
  func.func @transform_1(%arg0: i32) -> (i32, i32) {
    %c0_i32 = arith.constant 0 : i32
    %c0_i32_0 = arith.constant 0 : i32
    %c0_i32_1 = arith.constant 0 : i32
    return %c0_i32, %c0_i32_0 : i32, i32
  }
  func.func @transform_2(%arg0: i32) -> (i32, i32) {
    %c0_i32 = arith.constant 0 : i32
    %c0_i32_0 = arith.constant 0 : i32
    %c0_i32_1 = arith.constant 0 : i32
    return %c0_i32, %c0_i32_0 : i32, i32
  }
  func.func @transform_3(%arg0: i32) -> (i32, i32) {
    %c0_i32 = arith.constant 0 : i32
    %c0_i32_0 = arith.constant 0 : i32
    %c0_i32_1 = arith.constant 0 : i32
    return %c0_i32, %c0_i32_0 : i32, i32
  }
  func.func @transform_4(%arg0: i32) -> (i32, i32) {
    %c0_i32 = arith.constant 0 : i32
    %c0_i32_0 = arith.constant 0 : i32
    %c0_i32_1 = arith.constant 0 : i32
    return %c0_i32, %c0_i32_0 : i32, i32
  }
  func.func @transform_5(%arg0: i32) -> (i32, i32) {
    %c0_i32 = arith.constant 0 : i32
    %c0_i32_0 = arith.constant 0 : i32
    return %arg0, %c0_i32 : i32, i32
  }
}

</mosaic_0001>

<bundles_post_ra>
// kernel: drug_embedding_forward.1
= control target key start
LH: loop header
LB: loop body
LE: loop exit
PB: predicated region body
PF: predicated region fallthrough
CT: control target
= control target key end

     0   :  { %s3598_s0 = inlined_call_operand.vmem [shape: bf16[16,768], index: 0, kind: input, shape index: {}]   ;;  %s3599_s1 = inlined_call_operand.vmem [shape: bf16[768,512], index: 1, kind: input, shape index: {}]   ;;  %s3600_s2 = inlined_call_operand.vmem [shape: f32[1,512], index: 2, kind: input, shape index: {}]   ;;  %s3601_s3 = inlined_call_operand.vmem [shape: bf16[512,256], index: 3, kind: input, shape index: {}]   ;;  %s3602_s4 = inlined_call_operand.vmem [shape: f32[1,256], index: 4, kind: input, shape index: {}]   ;;  %s3603_s5 = inlined_call_operand.hbm [shape: f32[16,256], index: 5, kind: output, shape index: {}]  }
   0x1   :  { %v2304_v0 = vld [vmem:[%s3599_s1 + $0x4] ss:$16 sps:$4 sm:$0xff]   ;;  %v2308_v2 = vld [vmem:[%s3599_s1] ss:$16 sps:$4 sm:$0xff]  }
   0x2   :  { %v2306_v1 = vld [vmem:[%s3599_s1 + $0x204] ss:$16 sps:$4 sm:$0xff]   ;;  %1231 = vmatprep.subr.bf16.mxu1 %v2304_v0  ;;  %v2309_v3 = vld [vmem:[%s3599_s1 + $0x200] ss:$16 sps:$4 sm:$0xff]  }
   0x3   :  { %1274 = vmatprep.subr.bf16.mxu0 %v2306_v1  ;;  %v2310_v4 = vld [vmem:[%s3599_s1 + $0x24] ss:$16 sps:$4 sm:$0xff]   ;;  %1232 = vmatpush1.bf16.msra.mxu1 %v2308_v2  ;;  %v2314_v6 = vld [vmem:[%s3599_s1 + $0x20] ss:$16 sps:$4 sm:$0xff]  }
   0x4   :  { %1275 = vmatpush1.bf16.msra.mxu0 %v2309_v3  ;;  %v2312_v5 = vld [vmem:[%s3599_s1 + $0x224] ss:$16 sps:$4 sm:$0xff]   ;;  %1233 = vmatprep.subr.bf16.mxu1 %v2310_v4  ;;  %v2315_v7 = vld [vmem:[%s3599_s1 + $0x220] ss:$16 sps:$4 sm:$0xff]   ;;  %v2411_v3 = vld [vmem:[%s3599_s1 + $0xc] ss:$16 sps:$4 sm:$0xff]  }
   0x5   :  { %1276 = vmatprep.subr.bf16.mxu0 %v2312_v5  ;;  %v2316_v8 = vld [vmem:[%s3599_s1 + $0x44] ss:$16 sps:$4 sm:$0xff]   ;;  %v2320_v10 = vld [vmem:[%s3599_s1 + $0x40] ss:$16 sps:$4 sm:$0xff]  }
   0x6   :  { %v2318_v9 = vld [vmem:[%s3599_s1 + $0x244] ss:$16 sps:$4 sm:$0xff]   ;;  %v2321_v11 = vld [vmem:[%s3599_s1 + $0x240] ss:$16 sps:$4 sm:$0xff]  }
   0x7   :  { %1234 = vmatpush1.bf16.msra.mxu1 %v2314_v6  ;;  %v2322_v12 = vld [vmem:[%s3599_s1 + $0x64] ss:$16 sps:$4 sm:$0xff]   ;;  %v2326_v14 = vld [vmem:[%s3599_s1 + $0x60] ss:$16 sps:$4 sm:$0xff]  }
   0x8   :  { %1277 = vmatpush1.bf16.msra.mxu0 %v2315_v7  ;;  %1235 = vmatprep.subr.bf16.mxu1 %v2316_v8  ;;  %v2324_v13 = vld [vmem:[%s3599_s1 + $0x264] ss:$16 sps:$4 sm:$0xff]   ;;  %v2327_v15 = vld [vmem:[%s3599_s1 + $0x260] ss:$16 sps:$4 sm:$0xff]   ;;  %v2409_v7 = vld [vmem:[%s3599_s1 + $0x8] ss:$16 sps:$4 sm:$0xff]  }
   0x9   :  { %1278 = vmatprep.subr.bf16.mxu0 %v2318_v9  ;;  %v2328_v16 = vld [vmem:[%s3599_s1 + $0x84] ss:$16 sps:$4 sm:$0xff]   ;;  %v2332_v18 = vld [vmem:[%s3599_s1 + $0x80] ss:$16 sps:$4 sm:$0xff]   ;;  %v2417_v9 = vld [vmem:[%s3599_s1 + $0x2c] ss:$16 sps:$4 sm:$0xff]  }
   0xa   :  { %v2330_v17 = vld [vmem:[%s3599_s1 + $0x284] ss:$16 sps:$4 sm:$0xff]   ;;  %v2333_v19 = vld [vmem:[%s3599_s1 + $0x280] ss:$16 sps:$4 sm:$0xff]  }
   0xb   :  { %1236 = vmatpush1.bf16.msra.mxu1 %v2320_v10  ;;  %v2334_v20 = vld [vmem:[%s3599_s1 + $0xa4] ss:$16 sps:$4 sm:$0xff]   ;;  %v2338_v22 = vld [vmem:[%s3599_s1 + $0xa0] ss:$16 sps:$4 sm:$0xff]  }
   0xc   :  { %1279 = vmatpush1.bf16.msra.mxu0 %v2321_v11  ;;  %1237 = vmatprep.subr.bf16.mxu1 %v2322_v12  ;;  %v2336_v21 = vld [vmem:[%s3599_s1 + $0x2a4] ss:$16 sps:$4 sm:$0xff]   ;;  %v2339_v23 = vld [vmem:[%s3599_s1 + $0x2a0] ss:$16 sps:$4 sm:$0xff]   ;;  %v2415_v11 = vld [vmem:[%s3599_s1 + $0x28] ss:$16 sps:$4 sm:$0xff]  }
   0xd   :  { %1280 = vmatprep.subr.bf16.mxu0 %v2324_v13  ;;  %v2340_v24 = vld [vmem:[%s3599_s1 + $0xc4] ss:$16 sps:$4 sm:$0xff]   ;;  %v2344_v26 = vld [vmem:[%s3599_s1 + $0xc0] ss:$16 sps:$4 sm:$0xff]   ;;  %v2423_v13 = vld [vmem:[%s3599_s1 + $0x4c] ss:$16 sps:$4 sm:$0xff]  }
   0xe   :  { %v2342_v25 = vld [vmem:[%s3599_s1 + $0x2c4] ss:$16 sps:$4 sm:$0xff]   ;;  %v2345_v27 = vld [vmem:[%s3599_s1 + $0x2c0] ss:$16 sps:$4 sm:$0xff]  }
   0xf   :  { %1238 = vmatpush1.bf16.msra.mxu1 %v2326_v14  ;;  %v2346_v28 = vld [vmem:[%s3599_s1 + $0xe4] ss:$16 sps:$4 sm:$0xff]   ;;  %v2350_v30 = vld [vmem:[%s3599_s1 + $0xe0] ss:$16 sps:$4 sm:$0xff]  }
  0x10   :  { %1281 = vmatpush1.bf16.msra.mxu0 %v2327_v15  ;;  %1239 = vmatprep.subr.bf16.mxu1 %v2328_v16  ;;  %v2348_v29 = vld [vmem:[%s3599_s1 + $0x2e4] ss:$16 sps:$4 sm:$0xff]   ;;  %v2351_v31 = vld [vmem:[%s3599_s1 + $0x2e0] ss:$16 sps:$4 sm:$0xff]   ;;  %v2421_v15 = vld [vmem:[%s3599_s1 + $0x48] ss:$16 sps:$4 sm:$0xff]  }
  0x11   :  { %1282 = vmatprep.subr.bf16.mxu0 %v2330_v17  ;;  %v2352_v32 = vld [vmem:[%s3599_s1 + $0x104] ss:$16 sps:$4 sm:$0xff]   ;;  %v2356_v34 = vld [vmem:[%s3599_s1 + $0x100] ss:$16 sps:$4 sm:$0xff]   ;;  %v2429_v17 = vld [vmem:[%s3599_s1 + $0x6c] ss:$16 sps:$4 sm:$0xff]  }
  0x12   :  { %v2354_v33 = vld [vmem:[%s3599_s1 + $0x304] ss:$16 sps:$4 sm:$0xff]   ;;  %v2357_v35 = vld [vmem:[%s3599_s1 + $0x300] ss:$16 sps:$4 sm:$0xff]  }
  0x13   :  { %1240 = vmatpush1.bf16.msra.mxu1 %v2332_v18  ;;  %v2358_v36 = vld [vmem:[%s3599_s1 + $0x124] ss:$16 sps:$4 sm:$0xff]   ;;  %v2362_v38 = vld [vmem:[%s3599_s1 + $0x120] ss:$16 sps:$4 sm:$0xff]  }
  0x14   :  { %1283 = vmatpush1.bf16.msra.mxu0 %v2333_v19  ;;  %1241 = vmatprep.subr.bf16.mxu1 %v2334_v20  ;;  %v2360_v37 = vld [vmem:[%s3599_s1 + $0x324] ss:$16 sps:$4 sm:$0xff]   ;;  %v2363_v39 = vld [vmem:[%s3599_s1 + $0x320] ss:$16 sps:$4 sm:$0xff]   ;;  %v2427_v19 = vld [vmem:[%s3599_s1 + $0x68] ss:$16 sps:$4 sm:$0xff]  }
  0x15   :  { %1284 = vmatprep.subr.bf16.mxu0 %v2336_v21  ;;  %v2364_v40 = vld [vmem:[%s3599_s1 + $0x144] ss:$16 sps:$4 sm:$0xff]   ;;  %v2368_v42 = vld [vmem:[%s3599_s1 + $0x140] ss:$16 sps:$4 sm:$0xff]   ;;  %v2435_v21 = vld [vmem:[%s3599_s1 + $0x8c] ss:$16 sps:$4 sm:$0xff]  }
  0x16   :  { %v2366_v41 = vld [vmem:[%s3599_s1 + $0x344] ss:$16 sps:$4 sm:$0xff]   ;;  %v2369_v43 = vld [vmem:[%s3599_s1 + $0x340] ss:$16 sps:$4 sm:$0xff]  }
  0x17   :  { %1242 = vmatpush1.bf16.msra.mxu1 %v2338_v22  ;;  %v2370_v44 = vld [vmem:[%s3599_s1 + $0x164] ss:$16 sps:$4 sm:$0xff]   ;;  %v2374_v46 = vld [vmem:[%s3599_s1 + $0x160] ss:$16 sps:$4 sm:$0xff]  }
  0x18   :  { %1285 = vmatpush1.bf16.msra.mxu0 %v2339_v23  ;;  %1243 = vmatprep.subr.bf16.mxu1 %v2340_v24  ;;  %v2372_v45 = vld [vmem:[%s3599_s1 + $0x364] ss:$16 sps:$4 sm:$0xff]   ;;  %v2375_v47 = vld [vmem:[%s3599_s1 + $0x360] ss:$16 sps:$4 sm:$0xff]   ;;  %v2433_v23 = vld [vmem:[%s3599_s1 + $0x88] ss:$16 sps:$4 sm:$0xff]  }
  0x19   :  { %1286 = vmatprep.subr.bf16.mxu0 %v2342_v25  ;;  %v2376_v48 = vld [vmem:[%s3599_s1 + $0x184] ss:$16 sps:$4 sm:$0xff]   ;;  %v2380_v52 = vld [vmem:[%s3599_s1 + $0x180] ss:$16 sps:$4 sm:$0xff]   ;;  %v2441_v25 = vld [vmem:[%s3599_s1 + $0xac] ss:$16 sps:$4 sm:$0xff]  }
  0x1a   :  { %v2402_v49 = vld [vmem:[%s3598_s0 + $0x4] ss:$24 sps:$4 sm:$0xff]   ;;  %v2381_v53 = vld [vmem:[%s3599_s1 + $0x380] ss:$16 sps:$4 sm:$0xff]  }
  0x1b   :  { %1244 = vmatpush1.bf16.msra.mxu1 %v2344_v26  ;;  %v2378_v50 = vld [vmem:[%s3599_s1 + $0x384] ss:$16 sps:$4 sm:$0xff]   ;;  %1263 = vmatprep.mubr.bf16.mxu1 %v2402_v49  ;;  %v2386_v56 = vld [vmem:[%s3599_s1 + $0x1a0] ss:$16 sps:$4 sm:$0xff]  }
  0x1c   :  { %1287 = vmatpush1.bf16.msra.mxu0 %v2345_v27  ;;  %1245 = vmatprep.subr.bf16.mxu1 %v2346_v28  ;;  %v2910_v51 = vld [vmem:[%s3598_s0 + $0xc] ss:$24 sps:$4 sm:$0xff]   ;;  %v2387_v57 = vld [vmem:[%s3599_s1 + $0x3a0] ss:$16 sps:$4 sm:$0xff]   ;;  %v2439_v27 = vld [vmem:[%s3599_s1 + $0xa8] ss:$16 sps:$4 sm:$0xff]  }
  0x1d   :  { %1288 = vmatprep.subr.bf16.mxu0 %v2348_v29  ;;  %1306 = vmatprep.mubr.bf16.mxu0 %v2910_v51  ;;  %v2382_v54 = vld [vmem:[%s3599_s1 + $0x1a4] ss:$16 sps:$4 sm:$0xff]   ;;  %v2392_v60 = vld [vmem:[%s3599_s1 + $0x1c0] ss:$16 sps:$4 sm:$0xff]   ;;  %v2447_v29 = vld [vmem:[%s3599_s1 + $0xcc] ss:$16 sps:$4 sm:$0xff]  }
  0x1e   :  { %v2384_v55 = vld [vmem:[%s3599_s1 + $0x3a4] ss:$16 sps:$4 sm:$0xff]   ;;  %v2393_v61 = vld [vmem:[%s3599_s1 + $0x3c0] ss:$16 sps:$4 sm:$0xff]  }
  0x1f   :  { %1246 = vmatpush1.bf16.msra.mxu1 %v2350_v30  ;;  %v2388_v58 = vld [vmem:[%s3599_s1 + $0x1c4] ss:$16 sps:$4 sm:$0xff]   ;;  %v2398_v0 = vld [vmem:[%s3599_s1 + $0x1e0] ss:$16 sps:$4 sm:$0xff]  }
  0x20   :  { %1289 = vmatpush1.bf16.msra.mxu0 %v2351_v31  ;;  %1247 = vmatprep.subr.bf16.mxu1 %v2352_v32  ;;  %v2390_v59 = vld [vmem:[%s3599_s1 + $0x3c4] ss:$16 sps:$4 sm:$0xff]   ;;  %v2399_v1 = vld [vmem:[%s3599_s1 + $0x3e0] ss:$16 sps:$4 sm:$0xff]   ;;  %v2445_v31 = vld [vmem:[%s3599_s1 + $0xc8] ss:$16 sps:$4 sm:$0xff]  }
  0x21   :  { %1290 = vmatprep.subr.bf16.mxu0 %v2354_v33  ;;  %v2394_v62 = vld [vmem:[%s3599_s1 + $0x1e4] ss:$16 sps:$4 sm:$0xff]   ;;  %v2964_v4 = vld [vmem:[%s3598_s0] ss:$24 sps:$4 sm:$0xff]   ;;  %v2453_v33 = vld [vmem:[%s3599_s1 + $0xec] ss:$16 sps:$4 sm:$0xff]  }
  0x22   :  { %v2396_v63 = vld [vmem:[%s3599_s1 + $0x3e4] ss:$16 sps:$4 sm:$0xff]   ;;  %v2969_v5 = vld [vmem:[%s3598_s0 + $0x8] ss:$24 sps:$4 sm:$0xff]  }
  0x23   :  { %1248 = vmatpush1.bf16.msra.mxu1 %v2356_v34  ;;  %v2408_v2 = vld [vmem:[%s3599_s1 + $0x404] ss:$16 sps:$4 sm:$0xff]   ;;  %v2406_v6 = vld [vmem:[%s3599_s1 + $0x400] ss:$16 sps:$4 sm:$0xff]  }
  0x24   :  { %1291 = vmatpush1.bf16.msra.mxu0 %v2357_v35  ;;  %1249 = vmatprep.subr.bf16.mxu1 %v2358_v36  ;;  %v2414_v8 = vld [vmem:[%s3599_s1 + $0x424] ss:$16 sps:$4 sm:$0xff]   ;;  %v2412_v10 = vld [vmem:[%s3599_s1 + $0x420] ss:$16 sps:$4 sm:$0xff]   ;;  %v2451_v36 = vld [vmem:[%s3599_s1 + $0xe8] ss:$16 sps:$4 sm:$0xff]  }
  0x25   :  { %1292 = vmatprep.subr.bf16.mxu0 %v2360_v37  ;;  %v2420_v12 = vld [vmem:[%s3599_s1 + $0x444] ss:$16 sps:$4 sm:$0xff]   ;;  %v2418_v14 = vld [vmem:[%s3599_s1 + $0x440] ss:$16 sps:$4 sm:$0xff]  }
  0x26   :  { %v2426_v16 = vld [vmem:[%s3599_s1 + $0x464] ss:$16 sps:$4 sm:$0xff]   ;;  %v2424_v18 = vld [vmem:[%s3599_s1 + $0x460] ss:$16 sps:$4 sm:$0xff]  }
  0x27   :  { %1250 = vmatpush1.bf16.msra.mxu1 %v2362_v38  ;;  %v2432_v20 = vld [vmem:[%s3599_s1 + $0x484] ss:$16 sps:$4 sm:$0xff]   ;;  %v2430_v22 = vld [vmem:[%s3599_s1 + $0x480] ss:$16 sps:$4 sm:$0xff]   ;;  %v2459_v38 = vld [vmem:[%s3599_s1 + $0x10c] ss:$16 sps:$4 sm:$0xff]  }
  0x28   :  { %1293 = vmatpush1.bf16.msra.mxu0 %v2363_v39  ;;  %1251 = vmatprep.subr.bf16.mxu1 %v2364_v40  ;;  %v2438_v24 = vld [vmem:[%s3599_s1 + $0x4a4] ss:$16 sps:$4 sm:$0xff]   ;;  %v2436_v26 = vld [vmem:[%s3599_s1 + $0x4a0] ss:$16 sps:$4 sm:$0xff]   ;;  %v2457_v40 = vld [vmem:[%s3599_s1 + $0x108] ss:$16 sps:$4 sm:$0xff]  }
  0x29   :  { %1294 = vmatprep.subr.bf16.mxu0 %v2366_v41  ;;  %v2444_v28 = vld [vmem:[%s3599_s1 + $0x4c4] ss:$16 sps:$4 sm:$0xff]   ;;  %v2442_v30 = vld [vmem:[%s3599_s1 + $0x4c0] ss:$16 sps:$4 sm:$0xff]  }
  0x2a   :  { %v2450_v32 = vld [vmem:[%s3599_s1 + $0x4e4] ss:$16 sps:$4 sm:$0xff]   ;;  %v2448_v35 = vld [vmem:[%s3599_s1 + $0x4e0] ss:$16 sps:$4 sm:$0xff]  }
  0x2b   :  { %1252 = vmatpush1.bf16.msra.mxu1 %v2368_v42  ;;  %v3060_v34 = vld [vmem:[%s3598_s0 + $0x14] ss:$24 sps:$4 sm:$0xff]   ;;  %v2454_v39 = vld [vmem:[%s3599_s1 + $0x500] ss:$16 sps:$4 sm:$0xff]  }
  0x2c   :  { %1295 = vmatpush1.bf16.msra.mxu0 %v2369_v43  ;;  %1253 = vmatprep.subr.bf16.mxu1 %v2370_v44  ;;  %v2456_v37 = vld [vmem:[%s3599_s1 + $0x504] ss:$16 sps:$4 sm:$0xff]   ;;  %v2465_v42 = vld [vmem:[%s3599_s1 + $0x12c] ss:$16 sps:$4 sm:$0xff]   ;;  %v2460_v43 = vld [vmem:[%s3599_s1 + $0x520] ss:$16 sps:$4 sm:$0xff]  }
  0x2d   :  { %1296 = vmatprep.subr.bf16.mxu0 %v2372_v45  ;;  %v2462_v41 = vld [vmem:[%s3599_s1 + $0x524] ss:$16 sps:$4 sm:$0xff]   ;;  %v2463_v44 = vld [vmem:[%s3599_s1 + $0x128] ss:$16 sps:$4 sm:$0xff]  }
  0x2e   :  { %v2468_v45 = vld [vmem:[%s3599_s1 + $0x544] ss:$16 sps:$4 sm:$0xff]  }
  0x2f   :  { %1254 = vmatpush1.bf16.msra.mxu1 %v2374_v46  ;;  %v2471_v46 = vld [vmem:[%s3599_s1 + $0x14c] ss:$16 sps:$4 sm:$0xff]  }
  0x30   :  { %1297 = vmatpush1.bf16.msra.mxu0 %v2375_v47  ;;  %1255 = vmatprep.subr.bf16.mxu1 %v2376_v48  ;;  %v2466_v47 = vld [vmem:[%s3599_s1 + $0x540] ss:$16 sps:$4 sm:$0xff]   ;;  %v2469_v48 = vld [vmem:[%s3599_s1 + $0x148] ss:$16 sps:$4 sm:$0xff]  }
  0x31   :  { %1298 = vmatprep.subr.bf16.mxu0 %v2378_v50  ;;  %v2477_v50 = vld [vmem:[%s3599_s1 + $0x16c] ss:$16 sps:$4 sm:$0xff]  }
  0x33   :  { %1256 = vmatpush1.bf16.msra.mxu1 %v2380_v52  ;;  %v2472_v52 = vld [vmem:[%s3599_s1 + $0x560] ss:$16 sps:$4 sm:$0xff]  }
  0x34   :  { %1299 = vmatpush1.bf16.msra.mxu0 %v2381_v53  ;;  %1257 = vmatprep.subr.bf16.mxu1 %v2382_v54  ;;  %v2475_v53 = vld [vmem:[%s3599_s1 + $0x168] ss:$16 sps:$4 sm:$0xff]   ;;  %v2480_v54 = vld [vmem:[%s3599_s1 + $0x584] ss:$16 sps:$4 sm:$0xff]  }
  0x35   :  { %1300 = vmatprep.subr.bf16.mxu0 %v2384_v55  ;;  %v2483_v55 = vld [vmem:[%s3599_s1 + $0x18c] ss:$16 sps:$4 sm:$0xff]  }
  0x37   :  { %1258 = vmatpush1.bf16.msra.mxu1 %v2386_v56  ;;  %v2478_v56 = vld [vmem:[%s3599_s1 + $0x580] ss:$16 sps:$4 sm:$0xff]  }
  0x38   :  { %1301 = vmatpush1.bf16.msra.mxu0 %v2387_v57  ;;  %1259 = vmatprep.subr.bf16.mxu1 %v2388_v58  ;;  %v2481_v57 = vld [vmem:[%s3599_s1 + $0x188] ss:$16 sps:$4 sm:$0xff]   ;;  %v2486_v58 = vld [vmem:[%s3599_s1 + $0x5a4] ss:$16 sps:$4 sm:$0xff]  }
  0x39   :  { %1302 = vmatprep.subr.bf16.mxu0 %v2390_v59  ;;  %v2489_v59 = vld [vmem:[%s3599_s1 + $0x1ac] ss:$16 sps:$4 sm:$0xff]  }
  0x3b   :  { %1260 = vmatpush1.bf16.msra.mxu1 %v2392_v60  ;;  %v2484_v60 = vld [vmem:[%s3599_s1 + $0x5a0] ss:$16 sps:$4 sm:$0xff]  }
  0x3c   :  { %1303 = vmatpush1.bf16.msra.mxu0 %v2393_v61  ;;  %1261 = vmatprep.subr.bf16.mxu1 %v2394_v62  ;;  %v2487_v61 = vld [vmem:[%s3599_s1 + $0x1a8] ss:$16 sps:$4 sm:$0xff]   ;;  %v2492_v62 = vld [vmem:[%s3599_s1 + $0x5c4] ss:$16 sps:$4 sm:$0xff]  }
  0x3d   :  { %1304 = vmatprep.subr.bf16.mxu0 %v2396_v63  ;;  %v2495_v63 = vld [vmem:[%s3599_s1 + $0x1cc] ss:$16 sps:$4 sm:$0xff]  }
  0x3f   :  { %1262 = vmatpush1.bf16.msra.mxu1 %v2398_v0  ;;  %v2490_v0 = vld [vmem:[%s3599_s1 + $0x5c0] ss:$16 sps:$4 sm:$0xff]  }
  0x40   :  { %1305 = vmatpush1.bf16.msra.mxu0 %v2399_v1  ;;  %1360 = vmatprep.subr.bf16.mxu1 %v2411_v3  ;;  %v2493_v1 = vld [vmem:[%s3599_s1 + $0x1c8] ss:$16 sps:$4 sm:$0xff]   ;;  %v2501_v3 = vld [vmem:[%s3599_s1 + $0x1ec] ss:$16 sps:$4 sm:$0xff]  }
  0x41   :  { %1317 = vmatprep.subr.bf16.mxu0 %v2408_v2  ;;  %v2498_v2 = vld [vmem:[%s3599_s1 + $0x5e4] ss:$16 sps:$4 sm:$0xff]  }
  0x42   :  { %1264 = vmatmul.mubr.bf16.vlgmr.msra.gmra.mrb[0].mxu1 %v2964_v4 }
  0x43   :  { %1307 = vmatmul.mubr.bf16.vlgmr.msra.gmra.mrb[0].mxu0 %v2969_v5  ;;  %1361 = vmatpush1.bf16.msra.mxu1 %v2409_v7  ;;  %v2499_v7 = vld [vmem:[%s3599_s1 + $0x1e8] ss:$16 sps:$4 sm:$0xff]  }
  0x44   :  { %1318 = vmatpush1.bf16.msra.mxu0 %v2406_v6  ;;  %1362 = vmatprep.subr.bf16.mxu1 %v2417_v9  ;;  %v2496_v6 = vld [vmem:[%s3599_s1 + $0x5e0] ss:$16 sps:$4 sm:$0xff]  }
  0x45   :  { %1319 = vmatprep.subr.bf16.mxu0 %v2414_v8  ;;  %1392 = vmatprep.mubr.bf16.mxu1 %v2402_v49  ;;  %v2474_v49 = vld [vmem:[%s3599_s1 + $0x564] ss:$16 sps:$4 sm:$0xff]   ;;  %v2507_v8 = vld [vmem:[%s3599_s1 + $0x20c] ss:$16 sps:$4 sm:$0xff]   ;;  %v3171_v9 = vld [vmem:[%s3598_s0 + $0x10] ss:$24 sps:$4 sm:$0xff]  }
  0x46   :  { %1349 = vmatprep.mubr.bf16.mxu0 %v3060_v34 }
  0x47   :  { %1363 = vmatpush1.bf16.msra.mxu1 %v2415_v11  ;;  %v2510_v11 = vld [vmem:[%s3599_s1 + $0x22c] ss:$16 sps:$4 sm:$0xff]  }
  0x48   :  { %1320 = vmatpush1.bf16.msra.mxu0 %v2412_v10  ;;  %1364 = vmatprep.subr.bf16.mxu1 %v2423_v13  ;;  %v2505_v10 = vld [vmem:[%s3599_s1 + $0x208] ss:$16 sps:$4 sm:$0xff]   ;;  %v2513_v13 = vld [vmem:[%s3599_s1 + $0x24c] ss:$16 sps:$4 sm:$0xff]  }
  0x49   :  { %1321 = vmatprep.subr.bf16.mxu0 %v2420_v12  ;;  %v2508_v12 = vld [vmem:[%s3599_s1 + $0x228] ss:$16 sps:$4 sm:$0xff]  }
  0x4b   :  { %1365 = vmatpush1.bf16.msra.mxu1 %v2421_v15  ;;  %v2514_v15 = vld [vmem:[%s3599_s1 + $0x268] ss:$16 sps:$4 sm:$0xff]  }
  0x4c   :  { %1322 = vmatpush1.bf16.msra.mxu0 %v2418_v14  ;;  %1366 = vmatprep.subr.bf16.mxu1 %v2429_v17  ;;  %v2511_v14 = vld [vmem:[%s3599_s1 + $0x248] ss:$16 sps:$4 sm:$0xff]   ;;  %v2522_v17 = vld [vmem:[%s3599_s1 + $0x2ac] ss:$16 sps:$4 sm:$0xff]  }
  0x4d   :  { %1323 = vmatprep.subr.bf16.mxu0 %v2426_v16  ;;  %v2519_v16 = vld [vmem:[%s3599_s1 + $0x28c] ss:$16 sps:$4 sm:$0xff]  }
  0x4f   :  { %1367 = vmatpush1.bf16.msra.mxu1 %v2427_v19  ;;  %v2525_v19 = vld [vmem:[%s3599_s1 + $0x2cc] ss:$16 sps:$4 sm:$0xff]  }
  0x50   :  { %1324 = vmatpush1.bf16.msra.mxu0 %v2424_v18  ;;  %1368 = vmatprep.subr.bf16.mxu1 %v2435_v21  ;;  %v2520_v18 = vld [vmem:[%s3599_s1 + $0x2a8] ss:$16 sps:$4 sm:$0xff]   ;;  %v2528_v21 = vld [vmem:[%s3599_s1 + $0x2ec] ss:$16 sps:$4 sm:$0xff]  }
  0x51   :  { %1325 = vmatprep.subr.bf16.mxu0 %v2432_v20  ;;  %v2523_v20 = vld [vmem:[%s3599_s1 + $0x2c8] ss:$16 sps:$4 sm:$0xff]  }
  0x53   :  { %1369 = vmatpush1.bf16.msra.mxu1 %v2433_v23 }
  0x54   :  { %1326 = vmatpush1.bf16.msra.mxu0 %v2430_v22  ;;  %1370 = vmatprep.subr.bf16.mxu1 %v2441_v25 }
  0x55   :  { %1327 = vmatprep.subr.bf16.mxu0 %v2438_v24 }
  0x57   :  { %1371 = vmatpush1.bf16.msra.mxu1 %v2439_v27 }
  0x58   :  { %1328 = vmatpush1.bf16.msra.mxu0 %v2436_v26  ;;  %1372 = vmatprep.subr.bf16.mxu1 %v2447_v29 }
  0x59   :  { %1329 = vmatprep.subr.bf16.mxu0 %v2444_v28 }
  0x5b   :  { %1373 = vmatpush1.bf16.msra.mxu1 %v2445_v31 }
  0x5c   :  { %1330 = vmatpush1.bf16.msra.mxu0 %v2442_v30  ;;  %1374 = vmatprep.subr.bf16.mxu1 %v2453_v33 }
  0x5d   :  { %1331 = vmatprep.subr.bf16.mxu0 %v2450_v32 }
  0x5f   :  { %1375 = vmatpush1.bf16.msra.mxu1 %v2451_v36 }
  0x60   :  { %1332 = vmatpush1.bf16.msra.mxu0 %v2448_v35  ;;  %1376 = vmatprep.subr.bf16.mxu1 %v2459_v38 }
  0x61   :  { %1333 = vmatprep.subr.bf16.mxu0 %v2456_v37 }
  0x63   :  { %1377 = vmatpush1.bf16.msra.mxu1 %v2457_v40 }
  0x64   :  { %1334 = vmatpush1.bf16.msra.mxu0 %v2454_v39  ;;  %1378 = vmatprep.subr.bf16.mxu1 %v2465_v42 }
  0x65   :  { %1335 = vmatprep.subr.bf16.mxu0 %v2462_v41 }
  0x67   :  { %1379 = vmatpush1.bf16.msra.mxu1 %v2463_v44 }
  0x68   :  { %1336 = vmatpush1.bf16.msra.mxu0 %v2460_v43  ;;  %1380 = vmatprep.subr.bf16.mxu1 %v2471_v46 }
  0x69   :  { %1337 = vmatprep.subr.bf16.mxu0 %v2468_v45 }
  0x6b   :  { %1381 = vmatpush1.bf16.msra.mxu1 %v2469_v48 }
  0x6c   :  { %1338 = vmatpush1.bf16.msra.mxu0 %v2466_v47  ;;  %1382 = vmatprep.subr.bf16.mxu1 %v2477_v50 }
  0x6d   :  { %1339 = vmatprep.subr.bf16.mxu0 %v2474_v49 }
  0x6f   :  { %1383 = vmatpush1.bf16.msra.mxu1 %v2475_v53 }
  0x70   :  { %1340 = vmatpush1.bf16.msra.mxu0 %v2472_v52  ;;  %1384 = vmatprep.subr.bf16.mxu1 %v2483_v55 }
  0x71   :  { %1341 = vmatprep.subr.bf16.mxu0 %v2480_v54 }
  0x73   :  { %1385 = vmatpush1.bf16.msra.mxu1 %v2481_v57 }
  0x74   :  { %1342 = vmatpush1.bf16.msra.mxu0 %v2478_v56  ;;  %1386 = vmatprep.subr.bf16.mxu1 %v2489_v59 }
  0x75   :  { %1343 = vmatprep.subr.bf16.mxu0 %v2486_v58 }
  0x77   :  { %1387 = vmatpush1.bf16.msra.mxu1 %v2487_v61 }
  0x78   :  { %1344 = vmatpush1.bf16.msra.mxu0 %v2484_v60  ;;  %1388 = vmatprep.subr.bf16.mxu1 %v2495_v63 }
  0x79   :  { %1345 = vmatprep.subr.bf16.mxu0 %v2492_v62 }
  0x7b   :  { %1389 = vmatpush1.bf16.msra.mxu1 %v2493_v1 }
  0x7c   :  { %1346 = vmatpush1.bf16.msra.mxu0 %v2490_v0  ;;  %1390 = vmatprep.subr.bf16.mxu1 %v2501_v3 }
  0x7d   :  { %1347 = vmatprep.subr.bf16.mxu0 %v2498_v2 }
  0x7f   :  { %1391 = vmatpush1.bf16.msra.mxu1 %v2499_v7 }
  0x80   :  { %1348 = vmatpush1.bf16.msra.mxu0 %v2496_v6  ;;  %1403 = vmatprep.subr.bf16.mxu1 %v2507_v8 }
  0x82   :  { %1393 = vmatmul.mubr.bf16.vlgmr.msra.gmra.mrb[4].mxu1 %v2964_v4  ;;  %v2516_v4 = vld [vmem:[%s3599_s1 + $0x26c] ss:$16 sps:$4 sm:$0xff]  }
  0x83   :  { %1350 = vmatmul.mubr.bf16.vlgmr.msra.gmra.mrb[0].mxu0 %v3171_v9  ;;  %1404 = vmatpush1.bf16.msra.mxu1 %v2505_v10 }
  0x84   :  { %1435 = vmatprep.mubr.bf16.mxu1 %v2910_v51  ;;  %1405 = vmatprep.subr.bf16.mxu1 %v2510_v11  ;;  %v2517_v51 = vld [vmem:[%s3599_s1 + $0x288] ss:$16 sps:$4 sm:$0xff]  }
  0x87   :  { %1406 = vmatpush1.bf16.msra.mxu1 %v2508_v12 }
  0x88   :  { %1407 = vmatprep.subr.bf16.mxu1 %v2513_v13 }
  0x8b   :  { %1408 = vmatpush1.bf16.msra.mxu1 %v2511_v14 }
  0x8c   :  { %1409 = vmatprep.subr.bf16.mxu1 %v2516_v4 }
  0x8f   :  { %1410 = vmatpush1.bf16.msra.mxu1 %v2514_v15 }
  0x90   :  { %1411 = vmatprep.subr.bf16.mxu1 %v2519_v16 }
  0x93   :  { %1412 = vmatpush1.bf16.msra.mxu1 %v2517_v51 }
  0x94   :  { %1413 = vmatprep.subr.bf16.mxu1 %v2522_v17 }
  0x97   :  { %1414 = vmatpush1.bf16.msra.mxu1 %v2520_v18 }
  0x98   :  { %1415 = vmatprep.subr.bf16.mxu1 %v2525_v19 }
  0x99   :  { %10 = vsyncpa [#allocation3], 0  ;;  %v2601_v22 = vld [vmem:[%s3601_s3] ss:$8 sps:$4 sm:$0xff]   ;;  %v2603_v23 = vld [vmem:[%s3601_s3 + $0x4] ss:$8 sps:$4 sm:$0xff]  }
  0x9a   :  { %v2606_v24 = vld [vmem:[%s3601_s3 + $0x14] ss:$8 sps:$4 sm:$0xff]   ;;  %v2526_v25 = vld [vmem:[%s3599_s1 + $0x2e8] ss:$16 sps:$4 sm:$0xff]   ;;  %1897 = vmatprep.subr.bf16.mxu0 %v2603_v23  ;;  %v2609_v28 = vld [vmem:[%s3601_s3 + $0x24] ss:$8 sps:$4 sm:$0xff]  }
  0x9b   :  { %1416 = vmatpush1.bf16.msra.mxu1 %v2523_v20  ;;  %v2531_v26 = vld [vmem:[%s3599_s1 + $0x30c] ss:$16 sps:$4 sm:$0xff]   ;;  %1898 = vmatpush1.bf16.msra.mxu0 %v2601_v22  ;;  %v2604_v27 = vld [vmem:[%s3601_s3 + $0x10] ss:$8 sps:$4 sm:$0xff]   ;;  %v2607_v31 = vld [vmem:[%s3601_s3 + $0x20] ss:$8 sps:$4 sm:$0xff]  }
  0x9c   :  { %1417 = vmatprep.subr.bf16.mxu1 %v2528_v21  ;;  %1899 = vmatprep.subr.bf16.mxu0 %v2606_v24  ;;  %v2529_v29 = vld [vmem:[%s3599_s1 + $0x308] ss:$16 sps:$4 sm:$0xff]   ;;  %v2534_v30 = vld [vmem:[%s3599_s1 + $0x32c] ss:$16 sps:$4 sm:$0xff]   ;;  %s2721_s29 = smov [#allocation2]  }
  0x9d   :  { %v2612_v32 = vld [vmem:[%s3601_s3 + $0x34] ss:$8 sps:$4 sm:$0xff]   ;;  %v2532_v33 = vld [vmem:[%s3599_s1 + $0x328] ss:$16 sps:$4 sm:$0xff]   ;;  %v2615_v37 = vld [vmem:[%s3601_s3 + $0x44] ss:$8 sps:$4 sm:$0xff]  }
  0x9e   :  { %v2537_v35 = vld [vmem:[%s3599_s1 + $0x34c] ss:$16 sps:$4 sm:$0xff]   ;;  %v2610_v36 = vld [vmem:[%s3601_s3 + $0x30] ss:$8 sps:$4 sm:$0xff]   ;;  %v2613_v40 = vld [vmem:[%s3601_s3 + $0x40] ss:$8 sps:$4 sm:$0xff]  }
  0x9f   :  { %1418 = vmatpush1.bf16.msra.mxu1 %v2526_v25  ;;  %1900 = vmatpush1.bf16.msra.mxu0 %v2604_v27  ;;  %v2535_v38 = vld [vmem:[%s3599_s1 + $0x348] ss:$16 sps:$4 sm:$0xff]   ;;  %v2540_v39 = vld [vmem:[%s3599_s1 + $0x36c] ss:$16 sps:$4 sm:$0xff]   ;;  %s1996_s30 = sshll.u32 %s2721_s29, 4  ;;  %s1997_s30 = int_to_ptr.vmem [resolvable:$true] %s1996_s30 }
  0xa0   :  { %1419 = vmatprep.subr.bf16.mxu1 %v2531_v26  ;;  %1901 = vmatprep.subr.bf16.mxu0 %v2609_v28  ;;  %v2618_v41 = vld [vmem:[%s3601_s3 + $0x54] ss:$8 sps:$4 sm:$0xff]   ;;  %v2538_v42 = vld [vmem:[%s3599_s1 + $0x368] ss:$16 sps:$4 sm:$0xff]   ;;  %v2621_v45 = vld [vmem:[%s3601_s3 + $0x64] ss:$8 sps:$4 sm:$0xff]   ;;  %p2702_p1 = scmp.lt.s32.totalorder %s1997_s30, %s1997_s30 }
  0xa1   :  { %v2543_v43 = vld [vmem:[%s3599_s1 + $0x38c] ss:$16 sps:$4 sm:$0xff]   ;;  %v2616_v44 = vld [vmem:[%s3601_s3 + $0x50] ss:$8 sps:$4 sm:$0xff]   ;;  %v2619_v48 = vld [vmem:[%s3601_s3 + $0x60] ss:$8 sps:$4 sm:$0xff]  }
  0xa2   :  { %v2541_v46 = vld [vmem:[%s3599_s1 + $0x388] ss:$16 sps:$4 sm:$0xff]   ;;  %v2546_v47 = vld [vmem:[%s3599_s1 + $0x3ac] ss:$16 sps:$4 sm:$0xff]  }
  0xa3   :  { %1420 = vmatpush1.bf16.msra.mxu1 %v2529_v29  ;;  %1902 = vmatpush1.bf16.msra.mxu0 %v2607_v31  ;;  %v2624_v49 = vld [vmem:[%s3601_s3 + $0x74] ss:$8 sps:$4 sm:$0xff]   ;;  %v2544_v50 = vld [vmem:[%s3599_s1 + $0x3a8] ss:$16 sps:$4 sm:$0xff]   ;;  %v2627_v54 = vld [vmem:[%s3601_s3 + $0x84] ss:$8 sps:$4 sm:$0xff]  }
  0xa4   :  { %1421 = vmatprep.subr.bf16.mxu1 %v2534_v30  ;;  %1903 = vmatprep.subr.bf16.mxu0 %v2612_v32  ;;  %v2549_v52 = vld [vmem:[%s3599_s1 + $0x3cc] ss:$16 sps:$4 sm:$0xff]   ;;  %v2622_v53 = vld [vmem:[%s3601_s3 + $0x70] ss:$8 sps:$4 sm:$0xff]   ;;  %v2625_v57 = vld [vmem:[%s3601_s3 + $0x80] ss:$8 sps:$4 sm:$0xff]  }
  0xa5   :  { %v2547_v55 = vld [vmem:[%s3599_s1 + $0x3c8] ss:$16 sps:$4 sm:$0xff]   ;;  %v2552_v56 = vld [vmem:[%s3599_s1 + $0x3ec] ss:$16 sps:$4 sm:$0xff]  }
  0xa6   :  { %v2630_v58 = vld [vmem:[%s3601_s3 + $0x94] ss:$8 sps:$4 sm:$0xff]   ;;  %v2550_v59 = vld [vmem:[%s3599_s1 + $0x3e8] ss:$16 sps:$4 sm:$0xff]   ;;  %v2633_v62 = vld [vmem:[%s3601_s3 + $0xa4] ss:$8 sps:$4 sm:$0xff]  }
  0xa7   :  { %1422 = vmatpush1.bf16.msra.mxu1 %v2532_v33  ;;  %1904 = vmatpush1.bf16.msra.mxu0 %v2610_v36  ;;  %v2555_v60 = vld [vmem:[%s3599_s1 + $0x40c] ss:$16 sps:$4 sm:$0xff]   ;;  %v2628_v61 = vld [vmem:[%s3601_s3 + $0x90] ss:$8 sps:$4 sm:$0xff]   ;;  %v2631_v1 = vld [vmem:[%s3601_s3 + $0xa0] ss:$8 sps:$4 sm:$0xff]  }
  0xa8   :  { %1423 = vmatprep.subr.bf16.mxu1 %v2537_v35  ;;  %1905 = vmatprep.subr.bf16.mxu0 %v2615_v37  ;;  %v2553_v63 = vld [vmem:[%s3599_s1 + $0x408] ss:$16 sps:$4 sm:$0xff]   ;;  %v2558_v0 = vld [vmem:[%s3599_s1 + $0x42c] ss:$16 sps:$4 sm:$0xff]  }
  0xa9   :  { %v2636_v2 = vld [vmem:[%s3601_s3 + $0xb4] ss:$8 sps:$4 sm:$0xff]   ;;  %v2556_v3 = vld [vmem:[%s3599_s1 + $0x428] ss:$16 sps:$4 sm:$0xff]   ;;  %v2645_v17 = vld [vmem:[%s3601_s3 + $0xe4] ss:$8 sps:$4 sm:$0xff]  }
  0xaa   :  { %v2561_v6 = vld [vmem:[%s3599_s1 + $0x44c] ss:$16 sps:$4 sm:$0xff]   ;;  %v2634_v7 = vld [vmem:[%s3601_s3 + $0xb0] ss:$8 sps:$4 sm:$0xff]   ;;  %v2637_v10 = vld [vmem:[%s3601_s3 + $0xc0] ss:$8 sps:$4 sm:$0xff]  }
  0xab   :  { %1424 = vmatpush1.bf16.msra.mxu1 %v2535_v38  ;;  %1906 = vmatpush1.bf16.msra.mxu0 %v2613_v40  ;;  %v2564_v8 = vld [vmem:[%s3599_s1 + $0x46c] ss:$16 sps:$4 sm:$0xff]   ;;  %v2562_v12 = vld [vmem:[%s3599_s1 + $0x468] ss:$16 sps:$4 sm:$0xff]  }
  0xac   :  { %1425 = vmatprep.subr.bf16.mxu1 %v2540_v39  ;;  %1907 = vmatprep.subr.bf16.mxu0 %v2618_v41  ;;  %v2642_v11 = vld [vmem:[%s3601_s3 + $0xd4] ss:$8 sps:$4 sm:$0xff]   ;;  %v2640_v14 = vld [vmem:[%s3601_s3 + $0xd0] ss:$8 sps:$4 sm:$0xff]   ;;  %v2643_v19 = vld [vmem:[%s3601_s3 + $0xe0] ss:$8 sps:$4 sm:$0xff]  }
  0xad   :  { %v2567_v13 = vld [vmem:[%s3599_s1 + $0x48c] ss:$16 sps:$4 sm:$0xff]   ;;  %v2565_v4 = vld [vmem:[%s3599_s1 + $0x488] ss:$16 sps:$4 sm:$0xff]  }
  0xae   :  { %v2570_v15 = vld [vmem:[%s3599_s1 + $0x4ac] ss:$16 sps:$4 sm:$0xff]   ;;  %v2568_v16 = vld [vmem:[%s3599_s1 + $0x4a8] ss:$16 sps:$4 sm:$0xff]  }
  0xaf   :  { %1426 = vmatpush1.bf16.msra.mxu1 %v2538_v42  ;;  %1908 = vmatpush1.bf16.msra.mxu0 %v2616_v44  ;;  %v2573_v51 = vld [vmem:[%s3599_s1 + $0x4cc] ss:$16 sps:$4 sm:$0xff]   ;;  %v2571_v18 = vld [vmem:[%s3599_s1 + $0x4c8] ss:$16 sps:$4 sm:$0xff]  }
  0xb0   :  { %1427 = vmatprep.subr.bf16.mxu1 %v2543_v43  ;;  %1909 = vmatprep.subr.bf16.mxu0 %v2621_v45  ;;  %v2576_v20 = vld [vmem:[%s3599_s1 + $0x4ec] ss:$16 sps:$4 sm:$0xff]   ;;  %v2574_v22 = vld [vmem:[%s3599_s1 + $0x4e8] ss:$16 sps:$4 sm:$0xff]  }
  0xb1   :  { %v2648_v21 = vld [vmem:[%s3601_s3 + $0xf4] ss:$8 sps:$4 sm:$0xff]   ;;  %v2646_v23 = vld [vmem:[%s3601_s3 + $0xf0] ss:$8 sps:$4 sm:$0xff]   ;;  %v2651_v27 = vld [vmem:[%s3601_s3 + $0x104] ss:$8 sps:$4 sm:$0xff]  }
  0xb2   :  { %v2579_v24 = vld [vmem:[%s3599_s1 + $0x50c] ss:$16 sps:$4 sm:$0xff]   ;;  %v2577_v25 = vld [vmem:[%s3599_s1 + $0x508] ss:$16 sps:$4 sm:$0xff]  }
  0xb3   :  { %1428 = vmatpush1.bf16.msra.mxu1 %v2541_v46  ;;  %1910 = vmatpush1.bf16.msra.mxu0 %v2619_v48  ;;  %v2582_v26 = vld [vmem:[%s3599_s1 + $0x52c] ss:$16 sps:$4 sm:$0xff]   ;;  %v2580_v28 = vld [vmem:[%s3599_s1 + $0x528] ss:$16 sps:$4 sm:$0xff]   ;;  %v221_v46 = vlaneseq }
  0xb4   :  { %1429 = vmatprep.subr.bf16.mxu1 %v2546_v47  ;;  %1911 = vmatprep.subr.bf16.mxu0 %v2624_v49  ;;  %v2585_v29 = vld [vmem:[%s3599_s1 + $0x54c] ss:$16 sps:$4 sm:$0xff]   ;;  %v2583_v30 = vld [vmem:[%s3599_s1 + $0x548] ss:$16 sps:$4 sm:$0xff]   ;;  %v3473_v49 = vld [vmem:[%s3600_s2] sm:$0xf] }
  0xb5   :  { %v2588_v31 = vld [vmem:[%s3599_s1 + $0x56c] ss:$16 sps:$4 sm:$0xff]   ;;  %v2586_v32 = vld [vmem:[%s3599_s1 + $0x568] ss:$16 sps:$4 sm:$0xff]   ;;  %v3467_v47 = vshrl.u32 %v221_v46, 7 }
  0xb6   :  { %v2591_v33 = vld [vmem:[%s3599_s1 + $0x58c] ss:$16 sps:$4 sm:$0xff]   ;;  %v2589_v35 = vld [vmem:[%s3599_s1 + $0x588] ss:$16 sps:$4 sm:$0xff]  }
  0xb7   :  { %1430 = vmatpush1.bf16.msra.mxu1 %v2544_v50  ;;  %1912 = vmatpush1.bf16.msra.mxu0 %v2622_v53  ;;  %v2594_v36 = vld [vmem:[%s3599_s1 + $0x5ac] ss:$16 sps:$4 sm:$0xff]   ;;  %v2592_v37 = vld [vmem:[%s3599_s1 + $0x5a8] ss:$16 sps:$4 sm:$0xff]   ;;  %v223_v48 = vsub.s32 0, %v3467_v47  ;;  %v227_v50 = vsub.s32 1, %v3467_v47 }
  0xb8   :  { %1431 = vmatprep.subr.bf16.mxu1 %v2549_v52  ;;  %1913 = vmatprep.subr.bf16.mxu0 %v2627_v54  ;;  %v2597_v38 = vld [vmem:[%s3599_s1 + $0x5cc] ss:$16 sps:$4 sm:$0xff]   ;;  %v2595_v39 = vld [vmem:[%s3599_s1 + $0x5c8] ss:$16 sps:$4 sm:$0xff]  }
  0xb9   :  { %v2600_v40 = vld [vmem:[%s3599_s1 + $0x5ec] ss:$16 sps:$4 sm:$0xff]   ;;  %v2598_v41 = vld [vmem:[%s3599_s1 + $0x5e8] ss:$16 sps:$4 sm:$0xff]   ;;  %v228_v52 = vrot.slane %v3473_v49, %v227_v50 }
  0xbb   :  { %1432 = vmatpush1.bf16.msra.mxu1 %v2547_v55  ;;  %1914 = vmatpush1.bf16.msra.mxu0 %v2625_v57 }
  0xbc   :  { %1433 = vmatprep.subr.bf16.mxu1 %v2552_v56  ;;  %1915 = vmatprep.subr.bf16.mxu0 %v2630_v58 }
  0xbf   :  { %1434 = vmatpush1.bf16.msra.mxu1 %v2550_v59  ;;  %1916 = vmatpush1.bf16.msra.mxu0 %v2628_v61 }
  0xc0   :  { %1446 = vmatprep.subr.bf16.mxu1 %v2555_v60  ;;  %1917 = vmatprep.subr.bf16.mxu0 %v2633_v62 }
  0xc2   :  { %1436 = vmatmul.mubr.bf16.vlgmr.msra.gmra.mrb[4].mxu1 %v2969_v5  ;;  %v2639_v5 = vld [vmem:[%s3601_s3 + $0xc4] ss:$8 sps:$4 sm:$0xff]  }
  0xc3   :  { %1447 = vmatpush1.bf16.msra.mxu1 %v2553_v63  ;;  %1478 = vmatprep.mubr.bf16.mxu1 %v3060_v34  ;;  %v2559_v34 = vld [vmem:[%s3599_s1 + $0x448] ss:$16 sps:$4 sm:$0xff]  }
  0xc4   :  { %1448 = vmatprep.subr.bf16.mxu1 %v2558_v0  ;;  %1918 = vmatpush1.bf16.msra.mxu0 %v2631_v1 }
  0xc5   :  { %1919 = vmatprep.subr.bf16.mxu0 %v2636_v2 }
  0xc7   :  { %1449 = vmatpush1.bf16.msra.mxu1 %v2556_v3 }
  0xc8   :  { %1450 = vmatprep.subr.bf16.mxu1 %v2561_v6  ;;  %1920 = vmatpush1.bf16.msra.mxu0 %v2634_v7 }
  0xc9   :  { %1921 = vmatprep.subr.bf16.mxu0 %v2639_v5 }
  0xcb   :  { %1451 = vmatpush1.bf16.msra.mxu1 %v2559_v34  ;;  %v2649_v34 = vld [vmem:[%s3601_s3 + $0x100] ss:$8 sps:$4 sm:$0xff]  }
  0xcc   :  { %1452 = vmatprep.subr.bf16.mxu1 %v2564_v8  ;;  %1922 = vmatpush1.bf16.msra.mxu0 %v2637_v10  ;;  %v2654_v8 = vld [vmem:[%s3601_s3 + $0x114] ss:$8 sps:$4 sm:$0xff]   ;;  %v2652_v10 = vld [vmem:[%s3601_s3 + $0x110] ss:$8 sps:$4 sm:$0xff]  }
  0xcd   :  { %1923 = vmatprep.subr.bf16.mxu0 %v2642_v11  ;;  %v2657_v11 = vld [vmem:[%s3601_s3 + $0x124] ss:$8 sps:$4 sm:$0xff]  }
  0xcf   :  { %1453 = vmatpush1.bf16.msra.mxu1 %v2562_v12  ;;  %v2655_v12 = vld [vmem:[%s3601_s3 + $0x120] ss:$8 sps:$4 sm:$0xff]  }
  0xd0   :  { %1454 = vmatprep.subr.bf16.mxu1 %v2567_v13  ;;  %1924 = vmatpush1.bf16.msra.mxu0 %v2640_v14  ;;  %v2660_v13 = vld [vmem:[%s3601_s3 + $0x134] ss:$8 sps:$4 sm:$0xff]   ;;  %v2658_v14 = vld [vmem:[%s3601_s3 + $0x130] ss:$8 sps:$4 sm:$0xff]  }
  0xd1   :  { %1925 = vmatprep.subr.bf16.mxu0 %v2645_v17  ;;  %v2669_v17 = vld [vmem:[%s3601_s3 + $0x164] ss:$8 sps:$4 sm:$0xff]  }
  0xd3   :  { %1455 = vmatpush1.bf16.msra.mxu1 %v2565_v4  ;;  %v2663_v4 = vld [vmem:[%s3601_s3 + $0x144] ss:$8 sps:$4 sm:$0xff]  }
  0xd4   :  { %1456 = vmatprep.subr.bf16.mxu1 %v2570_v15  ;;  %1926 = vmatpush1.bf16.msra.mxu0 %v2643_v19  ;;  %v2661_v15 = vld [vmem:[%s3601_s3 + $0x140] ss:$8 sps:$4 sm:$0xff]   ;;  %v2672_v19 = vld [vmem:[%s3601_s3 + $0x174] ss:$8 sps:$4 sm:$0xff]  }
  0xd5   :  { %1927 = vmatprep.subr.bf16.mxu0 %v2648_v21  ;;  %v2675_v21 = vld [vmem:[%s3601_s3 + $0x184] ss:$8 sps:$4 sm:$0xff]  }
  0xd7   :  { %1457 = vmatpush1.bf16.msra.mxu1 %v2568_v16  ;;  %v2666_v16 = vld [vmem:[%s3601_s3 + $0x154] ss:$8 sps:$4 sm:$0xff]  }
  0xd8   :  { %1458 = vmatprep.subr.bf16.mxu1 %v2573_v51  ;;  %1928 = vmatpush1.bf16.msra.mxu0 %v2646_v23  ;;  %v2664_v51 = vld [vmem:[%s3601_s3 + $0x150] ss:$8 sps:$4 sm:$0xff]   ;;  %v2678_v23 = vld [vmem:[%s3601_s3 + $0x194] ss:$8 sps:$4 sm:$0xff]  }
  0xd9   :  { %1940 = vmatprep.subr.bf16.mxu0 %v2651_v27  ;;  %v2684_v27 = vld [vmem:[%s3601_s3 + $0x1b4] ss:$8 sps:$4 sm:$0xff]  }
  0xdb   :  { %1459 = vmatpush1.bf16.msra.mxu1 %v2571_v18  ;;  %v2667_v18 = vld [vmem:[%s3601_s3 + $0x160] ss:$8 sps:$4 sm:$0xff]  }
  0xdc   :  { %1460 = vmatprep.subr.bf16.mxu1 %v2576_v20  ;;  %v2670_v20 = vld [vmem:[%s3601_s3 + $0x170] ss:$8 sps:$4 sm:$0xff]  }
  0xdf   :  { %1461 = vmatpush1.bf16.msra.mxu1 %v2574_v22  ;;  %v2673_v22 = vld [vmem:[%s3601_s3 + $0x180] ss:$8 sps:$4 sm:$0xff]  }
  0xe0   :  { %1462 = vmatprep.subr.bf16.mxu1 %v2579_v24  ;;  %v2676_v24 = vld [vmem:[%s3601_s3 + $0x190] ss:$8 sps:$4 sm:$0xff]  }
  0xe3   :  { %1463 = vmatpush1.bf16.msra.mxu1 %v2577_v25  ;;  %v2681_v25 = vld [vmem:[%s3601_s3 + $0x1a4] ss:$8 sps:$4 sm:$0xff]  }
  0xe4   :  { %1464 = vmatprep.subr.bf16.mxu1 %v2582_v26  ;;  %v2679_v26 = vld [vmem:[%s3601_s3 + $0x1a0] ss:$8 sps:$4 sm:$0xff]  }
  0xe7   :  { %1465 = vmatpush1.bf16.msra.mxu1 %v2580_v28  ;;  %v2682_v28 = vld [vmem:[%s3601_s3 + $0x1b0] ss:$8 sps:$4 sm:$0xff]  }
  0xe8   :  { %1466 = vmatprep.subr.bf16.mxu1 %v2585_v29  ;;  %v2687_v29 = vld [vmem:[%s3601_s3 + $0x1c4] ss:$8 sps:$4 sm:$0xff]  }
  0xeb   :  { %1467 = vmatpush1.bf16.msra.mxu1 %v2583_v30  ;;  %v2685_v30 = vld [vmem:[%s3601_s3 + $0x1c0] ss:$8 sps:$4 sm:$0xff]  }
  0xec   :  { %1468 = vmatprep.subr.bf16.mxu1 %v2588_v31  ;;  %v2690_v31 = vld [vmem:[%s3601_s3 + $0x1d4] ss:$8 sps:$4 sm:$0xff]  }
  0xef   :  { %1469 = vmatpush1.bf16.msra.mxu1 %v2586_v32  ;;  %v2688_v32 = vld [vmem:[%s3601_s3 + $0x1d0] ss:$8 sps:$4 sm:$0xff]  }
  0xf0   :  { %1470 = vmatprep.subr.bf16.mxu1 %v2591_v33  ;;  %v2693_v33 = vld [vmem:[%s3601_s3 + $0x1e4] ss:$8 sps:$4 sm:$0xff]  }
  0xf3   :  { %1471 = vmatpush1.bf16.msra.mxu1 %v2589_v35  ;;  %v2691_v35 = vld [vmem:[%s3601_s3 + $0x1e0] ss:$8 sps:$4 sm:$0xff]  }
  0xf4   :  { %1472 = vmatprep.subr.bf16.mxu1 %v2594_v36  ;;  %v2696_v36 = vld [vmem:[%s3601_s3 + $0x1f4] ss:$8 sps:$4 sm:$0xff]  }
  0xf7   :  { %1473 = vmatpush1.bf16.msra.mxu1 %v2592_v37  ;;  %v2694_v37 = vld [vmem:[%s3601_s3 + $0x1f0] ss:$8 sps:$4 sm:$0xff]  }
  0xf8   :  { %1474 = vmatprep.subr.bf16.mxu1 %v2597_v38  ;;  %v231_v38 = vsub.s32 2, %v3467_v47 }
  0xfb   :  { %1475 = vmatpush1.bf16.msra.mxu1 %v2595_v39  ;;  %v235_v39 = vsub.s32 3, %v3467_v47 }
  0xfc   :  { %1476 = vmatprep.subr.bf16.mxu1 %v2600_v40  ;;  %v232_v40 = vrot.slane %v3473_v49, %v231_v38 }
  0xff   :  { %1477 = vmatpush1.bf16.msra.mxu1 %v2598_v41  ;;  %v236_v41 = vrot.slane %v3473_v49, %v235_v39 }
 0x102   :  { %1479 = vmatmul.mubr.bf16.vlgmr.msra.gmra.mrb[4].mxu1 %v3171_v9  ;;  %v224_v9 = vrot.slane %v3473_v49, %v223_v48  ;;  %v1565_v49 = vld [vmem:[%s3602_s4] sm:$0x3]  ;;  %s2697_s4 = scalar_lea.vmem %s1997_s30, 512 }
 0x103   :  { %p2698_p0 = scmp.ne.s32.totalorder %s1997_s30, %s2697_s4  ;;  %p2703_p2 = scmp.lt.s32.totalorder %s2697_s4, %s2697_s4 }
 0x105   :  { %p2704_p3 = por %p2703_p2, %p2702_p1 }
 0x107   :  { %p2705_p4 = pnand %p2704_p3, %p2698_p0 }
 0x115   :  { %v1265_v42 = vpop.f32.mrb[0].mxu1 }
 0x116   :  { %v1267_v43 = vpop.f32.mrb[1].mxu1  ;;  %v1266_v53 = vadd.f32 %v1265_v42, %v224_v9 }
 0x117   :  { %v1269_v44 = vpop.f32.mrb[2].mxu1  ;;  %v1268_v54 = vadd.f32 %v1267_v43, %v228_v52 }
 0x118   :  { %v1271_v45 = vpop.f32.mrb[3].mxu1  ;;  %v1270_v56 = vadd.f32 %v1269_v44, %v224_v9 }
 0x119   :  { %v1272_v59 = vadd.f32 %v1271_v45, %v228_v52 }
 0x156   :  { %v1351_v55 = vpop.f32.mrb[0].mxu0 }
 0x157   :  { %v2270_v57 = vadd.f32 %v1351_v55, %v1266_v53  ;;  %v1353_v58 = vpop.f32.mrb[1].mxu0 }
 0x158   :  { %v2272_v60 = vadd.f32 %v1353_v58, %v1268_v54  ;;  %v1355_v61 = vpop.f32.mrb[2].mxu0 }
 0x159   :  { %v2274_v62 = vadd.f32 %v1355_v61, %v1270_v56  ;;  %v1357_v63 = vpop.f32.mrb[3].mxu0  ;;  %v1489_v1 = vmax.f32 %v2270_v57, 0.0  ;;  %v1574_v61 = vrot.slane %v1565_v49, %v227_v50 }
 0x15a   :  { %v2276_v0 = vadd.f32 %v1357_v63, %v1272_v59  ;;  %v1490_v3 = vmax.f32 %v2272_v60, 0.0  ;;  %v1570_v60 = vrot.slane %v1565_v49, %v223_v48 }
 0x15b   :  { %v1493_v2 = vmax.f32 %v2274_v62, 0.0 }
 0x15c   :  { %v1494_v6 = vmax.f32 %v2276_v0, 0.0 }
 0x15d   :  { %v1497_v7 = vpack.c.bf16 %v1493_v2, %v1489_v1 }
 0x15e   :  { %v1498_v5 = vpack.c.bf16 %v1494_v6, %v1490_v3 }
 0x160   :  { %1929 = vmatprep.mubr.bf16.mxu0 %v1498_v5 }
 0x161   :  { %1930 = vmatmul.mubr.bf16.vlgmr.msra.gmra.mrb[4].mxu0 %v1497_v7 }
 0x162   :  { %1941 = vmatpush1.bf16.msra.mxu0 %v2649_v34 }
 0x163   :  { %1942 = vmatprep.subr.bf16.mxu0 %v2654_v8 }
 0x166   :  { %1943 = vmatpush1.bf16.msra.mxu0 %v2652_v10 }
 0x167   :  { %1944 = vmatprep.subr.bf16.mxu0 %v2657_v11 }
 0x16a   :  { %1945 = vmatpush1.bf16.msra.mxu0 %v2655_v12 }
 0x16b   :  { %1946 = vmatprep.subr.bf16.mxu0 %v2660_v13 }
 0x16e   :  { %1947 = vmatpush1.bf16.msra.mxu0 %v2658_v14 }
 0x16f   :  { %1948 = vmatprep.subr.bf16.mxu0 %v2663_v4 }
 0x172   :  { %1949 = vmatpush1.bf16.msra.mxu0 %v2661_v15 }
 0x173   :  { %1950 = vmatprep.subr.bf16.mxu0 %v2666_v16 }
 0x176   :  { %1951 = vmatpush1.bf16.msra.mxu0 %v2664_v51 }
 0x177   :  { %1952 = vmatprep.subr.bf16.mxu0 %v2669_v17 }
 0x17a   :  { %1953 = vmatpush1.bf16.msra.mxu0 %v2667_v18 }
 0x17b   :  { %1954 = vmatprep.subr.bf16.mxu0 %v2672_v19 }
 0x17e   :  { %1955 = vmatpush1.bf16.msra.mxu0 %v2670_v20 }
 0x17f   :  { %1956 = vmatprep.subr.bf16.mxu0 %v2675_v21 }
 0x182   :  { %1957 = vmatpush1.bf16.msra.mxu0 %v2673_v22 }
 0x183   :  { %1958 = vmatprep.subr.bf16.mxu0 %v2678_v23 }
 0x186   :  { %1959 = vmatpush1.bf16.msra.mxu0 %v2676_v24 }
 0x187   :  { %1960 = vmatprep.subr.bf16.mxu0 %v2681_v25 }
 0x18a   :  { %1961 = vmatpush1.bf16.msra.mxu0 %v2679_v26 }
 0x18b   :  { %1962 = vmatprep.subr.bf16.mxu0 %v2684_v27 }
 0x18e   :  { %1963 = vmatpush1.bf16.msra.mxu0 %v2682_v28 }
 0x18f   :  { %1964 = vmatprep.subr.bf16.mxu0 %v2687_v29 }
 0x192   :  { %1965 = vmatpush1.bf16.msra.mxu0 %v2685_v30 }
 0x193   :  { %1966 = vmatprep.subr.bf16.mxu0 %v2690_v31 }
 0x196   :  { %1967 = vmatpush1.bf16.msra.mxu0 %v2688_v32 }
 0x197   :  { %1968 = vmatprep.subr.bf16.mxu0 %v2693_v33 }
 0x19a   :  { %1969 = vmatpush1.bf16.msra.mxu0 %v2691_v35 }
 0x19b   :  { %1970 = vmatprep.subr.bf16.mxu0 %v2696_v36 }
 0x19e   :  { %1971 = vmatpush1.bf16.msra.mxu0 %v2694_v37 }
 0x1d5   :  { %v1480_v42 = vpop.f32.mrb[4].mxu1 }
 0x1d6   :  { %v2277_v43 = vadd.f32 %v1480_v42, %v232_v40  ;;  %v1482_v44 = vpop.f32.mrb[5].mxu1 }
 0x1d7   :  { %v2278_v45 = vadd.f32 %v1482_v44, %v236_v41  ;;  %v1484_v46 = vpop.f32.mrb[6].mxu1 }
 0x1d8   :  { %v2279_v9 = vadd.f32 %v1484_v46, %v232_v40  ;;  %v1486_v52 = vpop.f32.mrb[7].mxu1  ;;  %v1491_v54 = vmax.f32 %v2277_v43, 0.0 }
 0x1d9   :  { %v2280_v53 = vadd.f32 %v1486_v52, %v236_v41  ;;  %v1492_v56 = vmax.f32 %v2278_v45, 0.0 }
 0x1da   :  { %v1495_v55 = vmax.f32 %v2279_v9, 0.0 }
 0x1db   :  { %v1496_v57 = vmax.f32 %v2280_v53, 0.0 }
 0x1dc   :  { %v1499_v58 = vpack.c.bf16 %v1495_v55, %v1491_v54 }
 0x1dd   :  { %v1500_v59 = vpack.c.bf16 %v1496_v57, %v1492_v56 }
 0x1df   :  { %1972 = vmatprep.mubr.bf16.mxu0 %v1500_v59 }
 0x1e0   :  { %1973 = vmatmul.mubr.bf16.vlgmr.msra.gmra.mrb[4].mxu0 %v1499_v58 }
 0x2b3   :  { %v1974_v62 = vpop.f32.mrb[4].mxu0 }
 0x2b4   :  { %v2281_v63 = vadd.f32 %v1974_v62, %v1570_v60  ;;  %v1976_v0 = vpop.f32.mrb[5].mxu0 }
 0x2b5   :  { %v2282_v1 = vadd.f32 %v1976_v0, %v1574_v61  ;;  %v1978_v2 = vpop.f32.mrb[6].mxu0 }
 0x2b6   :  { %v1983_v3 = vmax.f32 %v2281_v63, 0.0  ;;  %v2283_v6 = vadd.f32 %v1978_v2, %v1570_v60  ;;  %v1980_v7 = vpop.f32.mrb[7].mxu0 }
 0x2b7   :  { %v1984_v5 = vmax.f32 %v2282_v1, 0.0  ;;  %v2284_v34 = vadd.f32 %v1980_v7, %v1574_v61 }
 0x2b8   :  { %1987 = vst [vmem:[#allocation2] sm:$0xff] %v1983_v3  ;;  %v1985_v8 = vmax.f32 %v2283_v6, 0.0 }
 0x2b9   :  { %1988 = vst [vmem:[#allocation2 + $0x8] sm:$0xff] %v1984_v5  ;;  %v1986_v48 = vmax.f32 %v2284_v34, 0.0 }
 0x2ba   :  { %1989 = vst [vmem:[#allocation2 + $0x10] sm:$0xff] %v1985_v8 }
 0x2bb   :  { %1990 = vst [vmem:[#allocation2 + $0x18] sm:$0xff] %v1986_v48 }
 0x2bc   :  { %2708 = shalt.err (!%p2705_p4)
}
 0x2bd   :  { %s2709_s8 = scalar_lea.hbm %s3603_s5, 512 }
 0x2be   :  { %p2710_p5 = scmp.ne.s32.totalorder %s3603_s5, %s2709_s8  ;;  %p2713_p6 = scmp.lt.u32.totalorder %s2709_s8, %s3603_s5 }
 0x2c0   :  { %p2715_p7 = pnand %p2713_p6, %p2710_p5 }
 0x2c2   :  { %2718 = shalt.err (!%p2715_p7)
}
 0x2c3   :  { %s2722_s13 = smov 256   ;;  %s2723_s14 = smov 16  }
 0x2c4   :  { %2002 = dma.vmem_to_hbm [thread:$0]  %s1997_s30, 512, %s3603_s5, [#allocation3], %s2722_s13, %s2722_s13, %s2723_s14  }
 0x2c5   :  { %2719 = dma.done.wait [#allocation3], 512  }
 0x2c6   :  { %2720 = vsyncadd [#allocation3], 4294966784 }
 0x2c7   :  { %2006 = vsyncpa [#allocation3], 1 }

</bundles_post_ra>
